<compile_context>
chip_gen: v5e
topology: v5e:2x2
jax: 0.10.0
libtpu: 0.0.40
codegen_flags: <defaults>
</compile_context>

<pallas_src>
import functools

import numpy as np
import jax
import jax.numpy as jnp
from jax import lax
from jax.experimental import pallas as pl
from jax.experimental.pallas import tpu as pltpu


def _round_up(x, n):
    return ((x + n - 1) // n) * n


# ----------------------------------------------------------------------------
# Deterministic Gabor weight construction (mirrors GFB.initialize / gabor_kernel)
# ----------------------------------------------------------------------------
def gabor_kernel(frequency, sigma_x, sigma_y, theta=0.0, offset=0.0, ks=25):
    w = ks // 2
    grid_val = np.arange(-w, w + 1, dtype=np.float64)
    x, y = np.meshgrid(grid_val, grid_val, indexing="ij")
    rotx = x * np.cos(theta) + y * np.sin(theta)
    roty = -x * np.sin(theta) + y * np.cos(theta)
    g = np.exp(-0.5 * (rotx ** 2 / sigma_x ** 2 + roty ** 2 / sigma_y ** 2))
    g /= 2.0 * np.pi * sigma_x * sigma_y
    g *= np.cos(2.0 * np.pi * frequency * rotx + offset)
    return g.astype(np.float32)


def build_gfb_weight(sf, theta, sigx, sigy, phase, in_channels, out_channels,
                     ksize, random_channel):
    w = np.zeros((out_channels, in_channels, ksize, ksize), dtype=np.float32)
    for i in range(out_channels):
        w[i, random_channel[i]] = gabor_kernel(
            frequency=sf[i], sigma_x=sigx[i], sigma_y=sigy[i],
            theta=theta[i], offset=phase[i], ks=ksize)
    return w


# ----------------------------------------------------------------------------
# Pallas kernel: one fused bf16 quadrature matmul + simple/complex epilogue
# ----------------------------------------------------------------------------
def _vone_kernel(p_ref, w_ref, o_ref, *, s_pad, c_pad):
    # Single MXU matmul for both quadrature phases, f32 accumulation.
    # Weight columns (constants already folded in):
    #   [0, s_pad)               : k_exc         * w_q0  (simple cells)
    #   [s_pad, s_pad + c_pad)   : k_exc/sqrt(2) * w_q0  (complex cells)
    #   [s_pad + c_pad, ...)     : k_exc/sqrt(2) * w_q1  (complex cells)
    q = jnp.dot(p_ref[...], w_ref[...], preferred_element_type=jnp.float32)
    if s_pad:
        # Simple cells: ReLU (final noise-path ReLU is redundant, k_exc > 0).
        o_ref[:, :s_pad] = jnp.maximum(q[:, :s_pad], 0.0)
    if c_pad:
        # Complex cells: quadrature energy (scale already folded into weights).
        q0c = q[:, s_pad:s_pad + c_pad]
        q1c = q[:, s_pad + c_pad:]
        o_ref[:, s_pad:] = jnp.sqrt(q0c * q0c + q1c * q1c)


def vone_block_forward(x, w_q0, w_q1, *, simple_channels, complex_channels,
                       k_exc, ksize, stride, tm=None):
    """x: [N, C_in, H, W] float32 (NCHW). Returns [N, C_out, Ho, Wo] float32."""
    assert k_exc > 0, "k_exc must be positive (folded into the weights)."
    pad = ksize // 2
    n, c_in, _, _ = x.shape
    c_out = simple_channels + complex_channels
    assert w_q0.shape[0] == c_out and w_q1.shape[0] == c_out
    kdim = c_in * ksize * ksize

    # Lane-aligned padded dimensions; simple/complex groups each get their own
    # 128 boundary so the epilogue and the stores are always lane-aligned.
    k_pad = _round_up(kdim, 128)
    s_pad = _round_up(simple_channels, 128) if simple_channels else 0
    c_pad = _round_up(complex_channels, 128) if complex_channels else 0
    n_out = s_pad + c_pad          # kernel output width
    wc = s_pad + 2 * c_pad         # fused weight slab width (q1-simple dropped)

    # Fused bf16 weight slab with k_exc / k_exc/sqrt(2) folded in (f32 math,
    # then a single bf16 rounding).
    ke = np.float32(k_exc)
    kec = np.float32(k_exc / np.sqrt(2.0))
    w0 = np.asarray(w_q0, np.float32).reshape(c_out, kdim)
    w1 = np.asarray(w_q1, np.float32).reshape(c_out, kdim)
    wf = np.zeros((k_pad, wc), dtype=np.float32)
    if simple_channels:
        wf[:kdim, :simple_channels] = (w0[:simple_channels] * ke).T
    if complex_channels:
        wf[:kdim, s_pad:s_pad + complex_channels] = (w0[simple_channels:] * kec).T
        wf[:kdim, s_pad + c_pad:s_pad + c_pad + complex_channels] = (
            w1[simple_channels:] * kec).T
    wf = jnp.asarray(wf, dtype=jnp.bfloat16)

    # im2col patches via a single fused XLA op, materialized directly in bf16
    # (feature order = (c, kh, kw), matching the torch OIHW weight flattening).
    patches = lax.conv_general_dilated_patches(
        x.astype(jnp.bfloat16), filter_shape=(ksize, ksize),
        window_strides=(stride, stride), padding=((pad, pad), (pad, pad)),
        dimension_numbers=("NCHW", "OIHW", "NHWC"))   # [N, Ho, Wo, C_in*ks*ks]
    _, ho, wo, kfeat = patches.shape
    assert kfeat == kdim, (kfeat, kdim)
    m = n * ho * wo
    patches = patches.reshape(m, kdim)

    # Row tile: v5e is MXU-bound at 256; v7x gets 512; v6e (128 MiB VMEM) 1024.
    if tm is None:
        tm = 256
        try:
            kind = jax.devices()[0].device_kind.lower()
            if "v6" in kind:
                tm = 1024
            elif "v7" in kind:
                tm = 512
        except Exception:
            pass
    if m < tm:
        tm = max(16, _round_up(m, 16))   # bf16 min sublane tile is (16, 128)

    # VMEM budget: double-buffered bf16 LHS tiles + bf16 weight slab + f32
    # output tiles + in-kernel f32 matmul result + headroom.
    def _vmem_est(tm_):
        return (2 * tm_ * k_pad * 2 + 2 * k_pad * wc * 2
                + 2 * tm_ * n_out * 4 + tm_ * wc * 4 + (4 << 20))
    while tm > 128 and _vmem_est(tm) > (48 << 20):
        tm //= 2
    vmem_limit = int(min(max(_vmem_est(tm), 16 << 20), 64 << 20))

    m_pad = _round_up(m, tm)
    patches = jnp.pad(patches, ((0, m_pad - m), (0, k_pad - kdim)))

    kernel = functools.partial(_vone_kernel, s_pad=s_pad, c_pad=c_pad)
    out_flat = pl.pallas_call(
        kernel,
        out_shape=jax.ShapeDtypeStruct((m_pad, n_out), jnp.float32),
        grid_spec=pltpu.PrefetchScalarGridSpec(
            num_scalar_prefetch=0,
            grid=(m_pad // tm,),
            in_specs=[
                pl.BlockSpec((tm, k_pad), lambda i: (i, 0)),
                # Constant weight slab (block index never changes).
                pl.BlockSpec((k_pad, wc), lambda i: (0, 0)),
            ],
            out_specs=pl.BlockSpec((tm, n_out), lambda i: (i, 0)),
        ),
        compiler_params=pltpu.CompilerParams(
            dimension_semantics=("parallel",),
            vmem_limit_bytes=vmem_limit),
    )(patches, wf)

    # Unpad the two lane-aligned groups and restore the module's NCHW contract.
    # TODO(synk): emit bf16 / keep NHWC if the downstream consumer tolerates it
    # to skip this full-output transpose.
    parts = []
    if simple_channels:
        parts.append(out_flat[:m, :simple_channels])
    if complex_channels:
        parts.append(out_flat[:m, s_pad:s_pad + complex_channels])
    out = parts[0] if len(parts) == 1 else jnp.concatenate(parts, axis=1)
    out = out.reshape(n, ho, wo, c_out).transpose(0, 3, 1, 2)
    return out


# ----------------------------------------------------------------------------
# Pure-JAX reference (XLA conv, full precision) for correctness checks
# ----------------------------------------------------------------------------
def vone_block_reference(x, w_q0, w_q1, *, simple_channels, k_exc, ksize, stride):
    pad = ksize // 2
    dn = lax.conv_dimension_numbers(x.shape, w_q0.shape, ("NCHW", "OIHW", "NCHW"))
    conv = lambda w: lax.conv_general_dilated(
        x, jnp.asarray(w, jnp.float32), (stride, stride),
        [(pad, pad), (pad, pad)], dimension_numbers=dn,
        precision=lax.Precision.HIGHEST)
    q0 = conv(w_q0)
    q1 = conv(w_q1)
    c = jnp.sqrt(q0[:, simple_channels:] ** 2 + q1[:, simple_channels:] ** 2) / np.sqrt(2.0)
    s = jax.nn.relu(q0[:, :simple_channels])
    out = k_exc * jnp.concatenate([s, c], axis=1)
    return jax.nn.relu(out)   # noise_mode=None -> final ReLU only


# ----------------------------------------------------------------------------
if __name__ == "__main__":
    # Small but faithful config (module defaults: ksize=25, stride=4, 128+128 ch).
    N, IN_CH, INPUT = 2, 3, 16
    SIMPLE, COMPLEX = 8, 8
    OUT_CH = SIMPLE + COMPLEX
    KSIZE, STRIDE = 7, 2
    K_EXC = 25.0

    rng = np.random.RandomState(0)
    sf = rng.uniform(0.05, 0.25, OUT_CH)
    theta = rng.uniform(0.0, np.pi, OUT_CH)
    sigx = rng.uniform(1.0, 3.0, OUT_CH)
    sigy = rng.uniform(1.0, 3.0, OUT_CH)
    phase = rng.uniform(0.0, 2.0 * np.pi, OUT_CH)
    # The quadrature pair (q0, q1) of each cell reads the same randomly chosen
    # input channel (VOneNet semantics for the complex-cell energy).
    rand_ch = rng.randint(0, IN_CH, OUT_CH)

    w_q0 = build_gfb_weight(sf, theta, sigx, sigy, phase,
                            IN_CH, OUT_CH, KSIZE, rand_ch)
    w_q1 = build_gfb_weight(sf, theta, sigx, sigy, phase + np.pi / 2.0,
                            IN_CH, OUT_CH, KSIZE, rand_ch)

    x = jax.random.normal(jax.random.PRNGKey(0), (N, IN_CH, INPUT, INPUT),
                          dtype=jnp.float32)

    out = vone_block_forward(x, w_q0, w_q1, simple_channels=SIMPLE,
                             complex_channels=COMPLEX, k_exc=K_EXC,
                             ksize=KSIZE, stride=STRIDE)
    out = jax.block_until_ready(out)
    assert out.shape == (N, OUT_CH, INPUT // STRIDE, INPUT // STRIDE), out.shape

    # Tight check: reference conv using the *effective* weights the kernel uses
    # (bf16 rounding applied after the k_exc / k_exc/sqrt(2) fold, then divided
    # back out), so the only remaining differences are f32 accumulation order.
    scale = np.where(np.arange(OUT_CH)[:, None, None, None] < SIMPLE,
                     np.float32(K_EXC),
                     np.float32(K_EXC / np.sqrt(2.0))).astype(np.float32)

    def _effective(wq):
        folded = np.asarray(wq, np.float32) * scale
        folded_bf = np.asarray(jnp.asarray(folded, jnp.bfloat16).astype(jnp.float32))
        return folded_bf / scale

    x_bf = x.astype(jnp.bfloat16).astype(jnp.float32)
    ref_tight = jax.block_until_ready(vone_block_reference(
        x_bf, _effective(w_q0), _effective(w_q1), simple_channels=SIMPLE,
        k_exc=K_EXC, ksize=KSIZE, stride=STRIDE))
    np.testing.assert_allclose(np.asarray(out), np.asarray(ref_tight),
                               rtol=2e-3, atol=2e-3)

    # Loose sanity check against the full-precision reference (bf16 operand
    # rounding + constant folding are the only approximations).
    ref = jax.block_until_ready(vone_block_reference(
        x, w_q0, w_q1, simple_channels=SIMPLE, k_exc=K_EXC,
        ksize=KSIZE, stride=STRIDE))
    np.testing.assert_allclose(np.asarray(out), np.asarray(ref),
                               rtol=5e-2, atol=2.5e-1)

    print("KERNEL_OK")
</pallas_src>

<mosaic_0001>
module attributes {stable_mosaic.version = 11 : i64} {
  func.func @_vone_kernel(%arg0: i32, %arg1: memref<128x256xbf16, #tpu.memory_space<vmem>>, %arg2: memref<256x384xbf16, #tpu.memory_space<vmem>>, %arg3: memref<128x256xf32, #tpu.memory_space<vmem>>) attributes {dimension_semantics = [#tpu.dimension_semantics<parallel>], iteration_bounds = array<i64: 1>, scalar_prefetch = 0 : i64, scratch_operands = 0 : i64, tpu.core_type = #tpu.core_type<tc>, window_params = [{transform_indices = @transform_0, window_bounds = array<i64: 128, 256>}, {pipeline_mode = #tpu.pipeline_mode<synchronous>, transform_indices = @transform_1, window_bounds = array<i64: 256, 384>}, {transform_indices = @transform_2, window_bounds = array<i64: 128, 256>}]} {
    %c0 = arith.constant 0 : index
    %c0_0 = arith.constant 0 : index
    %0 = vector.load %arg1[%c0, %c0_0] : memref<128x256xbf16, #tpu.memory_space<vmem>>, vector<128x256xbf16>
    %c0_1 = arith.constant 0 : index
    %c0_2 = arith.constant 0 : index
    %1 = vector.load %arg2[%c0_1, %c0_2] : memref<256x384xbf16, #tpu.memory_space<vmem>>, vector<256x384xbf16>
    %cst = arith.constant dense<0.000000e+00> : vector<128x384xf32>
    %2 = tpu.matmul %0, %1, %cst {dimension_numbers = #tpu.dot_dimension_numbers<[1], [0], [0], [1], [0, 0, 1, 1], [], []>} : vector<128x256xbf16>, vector<256x384xbf16>, vector<128x384xf32> -> vector<128x384xf32>
    %3 = vector.extract_strided_slice %2 {offsets = [0, 0], sizes = [128, 128], strides = [1, 1]} : vector<128x384xf32> to vector<128x128xf32>
    %cst_3 = arith.constant 0.000000e+00 : f32
    %4 = vector.broadcast %cst_3 : f32 to vector<128x128xf32>
    %5 = arith.maximumf %3, %4 : vector<128x128xf32>
    %c0_4 = arith.constant 0 : index
    %c0_5 = arith.constant 0 : index
    %6 = vector.load %arg3[%c0_4, %c0_5] : memref<128x256xf32, #tpu.memory_space<vmem>>, vector<128x128xf32>
    tpu.vector_store %arg3[%c0_4, %c0_5], %5 {strides = array<i32>} : memref<128x256xf32, #tpu.memory_space<vmem>>, vector<128x128xf32>,
    %7 = vector.extract_strided_slice %2 {offsets = [0, 128], sizes = [128, 128], strides = [1, 1]} : vector<128x384xf32> to vector<128x128xf32>
    %8 = vector.extract_strided_slice %2 {offsets = [0, 256], sizes = [128, 128], strides = [1, 1]} : vector<128x384xf32> to vector<128x128xf32>
    %9 = arith.mulf %7, %7 : vector<128x128xf32>
    %10 = arith.mulf %8, %8 : vector<128x128xf32>
    %11 = arith.addf %9, %10 : vector<128x128xf32>
    %12 = math.sqrt %11 : vector<128x128xf32>
    %c0_6 = arith.constant 0 : index
    %c128 = arith.constant 128 : index
    %13 = vector.load %arg3[%c0_6, %c128] : memref<128x256xf32, #tpu.memory_space<vmem>>, vector<128x128xf32>
    tpu.vector_store %arg3[%c0_6, %c128], %12 {strides = array<i32>} : memref<128x256xf32, #tpu.memory_space<vmem>>, vector<128x128xf32>,
    return
  }
  func.func @transform_0(%arg0: i32) -> (i32, i32) {
    %c0_i32 = arith.constant 0 : i32
    %c0_i32_0 = arith.constant 0 : i32
    return %arg0, %c0_i32 : i32, i32
  }
  func.func @transform_1(%arg0: i32) -> (i32, i32) {
    %c0_i32 = arith.constant 0 : i32
    %c0_i32_0 = arith.constant 0 : i32
    %c0_i32_1 = arith.constant 0 : i32
    return %c0_i32, %c0_i32_0 : i32, i32
  }
  func.func @transform_2(%arg0: i32) -> (i32, i32) {
    %c0_i32 = arith.constant 0 : i32
    %c0_i32_0 = arith.constant 0 : i32
    return %arg0, %c0_i32 : i32, i32
  }
}

</mosaic_0001>

<bundles_post_ra>
// kernel: tpu_custom_call.1
= control target key start
LH: loop header
LB: loop body
LE: loop exit
PB: predicated region body
PF: predicated region fallthrough
CT: control target
= control target key end

     0   :  { %7 = vsyncpa [#allocation3], 0  ;;  %s1709_s0 = inlined_call_operand.hbm [shape: bf16[128,256], index: 0, kind: input, shape index: {}]   ;;  %s1710_s1 = inlined_call_operand.hbm [shape: bf16[256,384], index: 1, kind: input, shape index: {}]   ;;  %s1711_s2 = inlined_call_operand.hbm [shape: f32[128,256], index: 2, kind: output, shape index: {}]  }
   0x1   :  { %8 = vsyncpa [#allocation6], 0 }
   0x2   :  { %9 = vsyncpa [#allocation4], 0  ;;  %s14_s11 = sshll.u32 %s1709_s0, 4  ;;  %s1517_s12 = smov [#allocation2]   ;;  %s15_s11 = int_to_ptr.hbm [resolvable:$true] %s14_s11 }
   0x3   :  { %s16_s13 = sshll.u32 %s1517_s12, 4  ;;  %s27_s16 = sshll.u32 %s1710_s1, 4  ;;  %s17_s13 = int_to_ptr.vmem [resolvable:$true] %s16_s13  ;;  %s28_s16 = int_to_ptr.hbm [resolvable:$true] %s27_s16 }
   0x4   :  { %s1518_s17 = smov 128   ;;  %s1519_s18 = smov 8  }
   0x5   :  { %22 = dma.hbm_to_vmem [thread:$0]  %s15_s11, 2048, %s17_s13, [#allocation3], %s1518_s17, %s1518_s17, %s1519_s18  }
   0x6   :  { %s1520_s19 = smov [#allocation5]   ;;  %s1521_s21 = smov 192  }
   0x7   :  { %s29_s20 = sshll.u32 %s1520_s19, 4  ;;  %s1522_s22 = smov 12   ;;  %s30_s20 = int_to_ptr.vmem [resolvable:$true] %s29_s20 }
   0x8   :  { %35 = dma.hbm_to_vmem [thread:$0]  %s28_s16, 6144, %s30_s20, [#allocation6], %s1521_s21, %s1521_s21, %s1522_s22  }
   0x9   :  { %1511 = dma.done.wait [#allocation3], 2048  }
   0xa   :  { %1512 = vsyncadd [#allocation3], 4294965248 }
   0xb   :  { %1513 = dma.done.wait [#allocation6], 6144  }
   0xc   :  { %1514 = vsyncadd [#allocation6], 4294961152  ;;  %v1212_v0 = vld [vmem:[#allocation5 + $0xa8] sm:$0xf]  ;;  %v1356_v1 = vld [vmem:[#allocation5 + $0xb0] sm:$0xf0] }
   0xd   :  { %v1308_v2 = vld [vmem:[#allocation5 + $0x168] sm:$0xf]  ;;  %v1213_v3 = vor.u32 %v1356_v1, %v1212_v0  ;;  %v1380_v4 = vld [vmem:[#allocation5 + $0x170] sm:$0xf0]  ;;  %v1200_v5 = vld [vmem:[#allocation5 + $0x90] sm:$0xf] }
   0xe   :  { %v1353_v6 = vld [vmem:[#allocation5 + $0x98] sm:$0xf0]  ;;  %v1309_v7 = vor.u32 %v1380_v4, %v1308_v2  ;;  %v1296_v8 = vld [vmem:[#allocation5 + $0x150] sm:$0xf]  ;;  %v1188_v12 = vld [vmem:[#allocation5 + $0x78] sm:$0xf] }
   0xf   :  { %v1377_v9 = vld [vmem:[#allocation5 + $0x158] sm:$0xf0]  ;;  %460 = vmatpush.bf16.msra.mxu0 %v1213_v3  ;;  %1382 = vmatpush.bf16.msra.mxu2 %v1213_v3  ;;  %v1201_v10 = vor.u32 %v1353_v6, %v1200_v5  ;;  %v1350_v13 = vld [vmem:[#allocation5 + $0x80] sm:$0xf0]  ;;  %v1284_v14 = vld [vmem:[#allocation5 + $0x138] sm:$0xf] }
  0x10   :  { %509 = vmatpush.bf16.msra.mxu1 %v1309_v7  ;;  %1390 = vmatpush.bf16.msra.mxu3 %v1309_v7  ;;  %v1297_v11 = vor.u32 %v1377_v9, %v1296_v8  ;;  %v1374_v15 = vld [vmem:[#allocation5 + $0x140] sm:$0xf0]  ;;  %v1189_v16 = vor.u32 %v1350_v13, %v1188_v12  ;;  %v1176_v18 = vld [vmem:[#allocation5 + $0x60] sm:$0xf]  ;;  %v1347_v19 = vld [vmem:[#allocation5 + $0x68] sm:$0xf0] }
  0x11   :  { %v1285_v17 = vor.u32 %v1374_v15, %v1284_v14  ;;  %v1272_v20 = vld [vmem:[#allocation5 + $0x120] sm:$0xf]  ;;  %v1371_v21 = vld [vmem:[#allocation5 + $0x128] sm:$0xf0]  ;;  %v1177_v22 = vor.u32 %v1347_v19, %v1176_v18  ;;  %v1164_v24 = vld [vmem:[#allocation5 + $0x48] sm:$0xf] }
  0x12   :  { %v1273_v23 = vor.u32 %v1371_v21, %v1272_v20  ;;  %v1344_v25 = vld [vmem:[#allocation5 + $0x50] sm:$0xf0]  ;;  %v1260_v26 = vld [vmem:[#allocation5 + $0x108] sm:$0xf]  ;;  %v1152_v30 = vld [vmem:[#allocation5 + $0x30] sm:$0xf] }
  0x13   :  { %461 = vmatpush.bf16.msra.mxu0 %v1201_v10  ;;  %1383 = vmatpush.bf16.msra.mxu2 %v1201_v10  ;;  %v1368_v27 = vld [vmem:[#allocation5 + $0x110] sm:$0xf0]  ;;  %v1165_v28 = vor.u32 %v1344_v25, %v1164_v24  ;;  %v1341_v31 = vld [vmem:[#allocation5 + $0x38] sm:$0xf0]  ;;  %v1248_v32 = vld [vmem:[#allocation5 + $0xf0] sm:$0xf] }
  0x14   :  { %510 = vmatpush.bf16.msra.mxu1 %v1297_v11  ;;  %1391 = vmatpush.bf16.msra.mxu3 %v1297_v11  ;;  %v1261_v29 = vor.u32 %v1368_v27, %v1260_v26  ;;  %v1365_v33 = vld [vmem:[#allocation5 + $0xf8] sm:$0xf0]  ;;  %v1153_v34 = vor.u32 %v1341_v31, %v1152_v30  ;;  %v1140_v36 = vld [vmem:[#allocation5 + $0x18] sm:$0xf]  ;;  %v1338_v37 = vld [vmem:[#allocation5 + $0x20] sm:$0xf0] }
  0x15   :  { %v1249_v35 = vor.u32 %v1365_v33, %v1248_v32  ;;  %v1236_v38 = vld [vmem:[#allocation5 + $0xd8] sm:$0xf]  ;;  %v1362_v39 = vld [vmem:[#allocation5 + $0xe0] sm:$0xf0]  ;;  %v1141_v40 = vor.u32 %v1338_v37, %v1140_v36  ;;  %v1128_v41 = vld [vmem:[#allocation5] sm:$0xf] }
  0x16   :  { %v1237_v42 = vor.u32 %v1362_v39, %v1236_v38  ;;  %v1335_v43 = vld [vmem:[#allocation5 + $0x8] sm:$0xf0]  ;;  %v1224_v44 = vld [vmem:[#allocation5 + $0xc0] sm:$0xf]  ;;  %v1319_v47 = vld [vmem:[#allocation2 + $0x4] sm:$0xf0] }
  0x17   :  { %462 = vmatpush.bf16.msra.mxu0 %v1189_v16  ;;  %1384 = vmatpush.bf16.msra.mxu2 %v1189_v16  ;;  %v1359_v45 = vld [vmem:[#allocation5 + $0xc8] sm:$0xf0]  ;;  %v1064_v46 = vld [vmem:[#allocation2] sm:$0xf]  ;;  %v1327_v49 = vld [vmem:[#allocation2 + $0x44] sm:$0xf0]  ;;  %v1129_v54 = vor.u32 %v1335_v43, %v1128_v41 }
  0x18   :  { %511 = vmatpush.bf16.msra.mxu1 %v1285_v17  ;;  %1392 = vmatpush.bf16.msra.mxu3 %v1285_v17  ;;  %v1096_v48 = vld [vmem:[#allocation2 + $0x40] sm:$0xf]  ;;  %v1355_v50 = vld [vmem:[#allocation5 + $0xac] sm:$0xf]  ;;  %v1214_v51 = vld [vmem:[#allocation5 + $0xb4] sm:$0xf0]  ;;  %v1225_v58 = vor.u32 %v1359_v45, %v1224_v44  ;;  %v1547_v3 = vor.u32 %v1319_v47, %v1064_v46 }
  0x19   :  { %v1379_v52 = vld [vmem:[#allocation5 + $0x16c] sm:$0xf]  ;;  %v1310_v53 = vld [vmem:[#allocation5 + $0x174] sm:$0xf0]  ;;  %v1318_v55 = vld [vmem:[#allocation2 + $0x4] sm:$0xf]  ;;  %v1217_v62 = vor.u32 %v1355_v50, %v1214_v51  ;;  %v1549_v4 = vor.u32 %v1327_v49, %v1096_v48 }
  0x1a   :  { %v1066_v56 = vld [vmem:[#allocation2 + $0x8] sm:$0xf0]  ;;  %v1326_v57 = vld [vmem:[#allocation2 + $0x44] sm:$0xf]  ;;  %v1220_v60 = vld [vmem:[#allocation5 + $0xb0] sm:$0xf]  ;;  %v1313_v63 = vor.u32 %v1379_v52, %v1310_v53 }
  0x1b   :  { %463 = vmatpush.bf16.msra.mxu0 %v1177_v22  ;;  %1385 = vmatpush.bf16.msra.mxu2 %v1177_v22  ;;  %v1098_v59 = vld [vmem:[#allocation2 + $0x48] sm:$0xf0]  ;;  %v1357_v61 = vld [vmem:[#allocation5 + $0xb8] sm:$0xf0]  ;;  %v1316_v0 = vld [vmem:[#allocation5 + $0x170] sm:$0xf]  ;;  %v1551_v8 = vor.u32 %v1318_v55, %v1066_v56 }
  0x1c   :  { %512 = vmatpush.bf16.msra.mxu1 %v1273_v23  ;;  %1393 = vmatpush.bf16.msra.mxu3 %v1273_v23  ;;  %v1381_v1 = vld [vmem:[#allocation5 + $0x178] sm:$0xf0]  ;;  %v1352_v2 = vld [vmem:[#allocation5 + $0x94] sm:$0xf]  ;;  %v1202_v5 = vld [vmem:[#allocation5 + $0x9c] sm:$0xf0]  ;;  %v1553_v9 = vor.u32 %v1326_v57, %v1098_v59  ;;  %v1221_v10 = vor.u32 %v1357_v61, %v1220_v60 }
  0x1d   :  { %v1376_v6 = vld [vmem:[#allocation5 + $0x154] sm:$0xf]  ;;  %v1298_v7 = vld [vmem:[#allocation5 + $0x15c] sm:$0xf0]  ;;  %v1317_v11 = vor.u32 %v1381_v1, %v1316_v0  ;;  %v1208_v12 = vld [vmem:[#allocation5 + $0x98] sm:$0xf]  ;;  %v1205_v14 = vor.u32 %v1352_v2, %v1202_v5 }
  0x1e   :  { %v1354_v13 = vld [vmem:[#allocation5 + $0xa0] sm:$0xf0]  ;;  %v1301_v15 = vor.u32 %v1376_v6, %v1298_v7  ;;  %v1304_v16 = vld [vmem:[#allocation5 + $0x158] sm:$0xf]  ;;  %v1349_v18 = vld [vmem:[#allocation5 + $0x7c] sm:$0xf] }
  0x1f   :  { %464 = vmatpush.bf16.msra.mxu0 %v1165_v28  ;;  %1386 = vmatpush.bf16.msra.mxu2 %v1165_v28  ;;  %v1378_v17 = vld [vmem:[#allocation5 + $0x160] sm:$0xf0]  ;;  %v1190_v19 = vld [vmem:[#allocation5 + $0x84] sm:$0xf0]  ;;  %v1373_v20 = vld [vmem:[#allocation5 + $0x13c] sm:$0xf]  ;;  %v1209_v22 = vor.u32 %v1354_v13, %v1208_v12 }
  0x20   :  { %513 = vmatpush.bf16.msra.mxu1 %v1261_v29  ;;  %1394 = vmatpush.bf16.msra.mxu3 %v1261_v29  ;;  %v1286_v21 = vld [vmem:[#allocation5 + $0x144] sm:$0xf0]  ;;  %v1305_v23 = vor.u32 %v1378_v17, %v1304_v16  ;;  %v1196_v24 = vld [vmem:[#allocation5 + $0x80] sm:$0xf]  ;;  %v1351_v25 = vld [vmem:[#allocation5 + $0x88] sm:$0xf0]  ;;  %v1193_v26 = vor.u32 %v1349_v18, %v1190_v19 }
  0x21   :  { %v1289_v27 = vor.u32 %v1373_v20, %v1286_v21  ;;  %v1292_v28 = vld [vmem:[#allocation5 + $0x140] sm:$0xf]  ;;  %v1375_v29 = vld [vmem:[#allocation5 + $0x148] sm:$0xf0]  ;;  %v1346_v30 = vld [vmem:[#allocation5 + $0x64] sm:$0xf] }
  0x22   :  { %v1178_v31 = vld [vmem:[#allocation5 + $0x6c] sm:$0xf0]  ;;  %v1370_v32 = vld [vmem:[#allocation5 + $0x124] sm:$0xf]  ;;  %v1184_v36 = vld [vmem:[#allocation5 + $0x68] sm:$0xf] }
  0x23   :  { %465 = vmatpush.bf16.msra.mxu0 %v1153_v34  ;;  %1387 = vmatpush.bf16.msra.mxu2 %v1153_v34  ;;  %v1274_v33 = vld [vmem:[#allocation5 + $0x12c] sm:$0xf0]  ;;  %v1197_v34 = vor.u32 %v1351_v25, %v1196_v24  ;;  %v1348_v37 = vld [vmem:[#allocation5 + $0x70] sm:$0xf0]  ;;  %v1321_v39 = vld [vmem:[#allocation2 + $0x14] sm:$0xf0] }
  0x24   :  { %514 = vmatpush.bf16.msra.mxu1 %v1249_v35  ;;  %1395 = vmatpush.bf16.msra.mxu3 %v1249_v35  ;;  %v1293_v35 = vor.u32 %v1375_v29, %v1292_v28  ;;  %v1072_v38 = vld [vmem:[#allocation2 + $0x10] sm:$0xf]  ;;  %v1329_v41 = vld [vmem:[#allocation2 + $0x54] sm:$0xf0]  ;;  %v1277_v43 = vor.u32 %v1370_v32, %v1274_v33  ;;  %v1280_v44 = vld [vmem:[#allocation5 + $0x128] sm:$0xf] }
  0x25   :  { %v1372_v45 = vld [vmem:[#allocation5 + $0x130] sm:$0xf0]  ;;  %v1343_v46 = vld [vmem:[#allocation5 + $0x4c] sm:$0xf]  ;;  %v1166_v47 = vld [vmem:[#allocation5 + $0x54] sm:$0xf0] }
  0x26   :  { %v1367_v48 = vld [vmem:[#allocation5 + $0x10c] sm:$0xf]  ;;  %v1262_v49 = vld [vmem:[#allocation5 + $0x114] sm:$0xf0]  ;;  %v1320_v50 = vld [vmem:[#allocation2 + $0x14] sm:$0xf]  ;;  %v1281_v55 = vor.u32 %v1372_v45, %v1280_v44 }
  0x27   :  { %466 = vmatpush.bf16.msra.mxu0 %v1141_v40  ;;  %1388 = vmatpush.bf16.msra.mxu2 %v1141_v40  ;;  %v1104_v40 = vld [vmem:[#allocation2 + $0x50] sm:$0xf]  ;;  %v1074_v51 = vld [vmem:[#allocation2 + $0x18] sm:$0xf0]  ;;  %v1328_v52 = vld [vmem:[#allocation2 + $0x54] sm:$0xf]  ;;  %v1265_v59 = vor.u32 %v1367_v48, %v1262_v49 }
  0x28   :  { %515 = vmatpush.bf16.msra.mxu1 %v1237_v42  ;;  %1396 = vmatpush.bf16.msra.mxu3 %v1237_v42  ;;  %v1181_v42 = vor.u32 %v1346_v30, %v1178_v31  ;;  %v1106_v53 = vld [vmem:[#allocation2 + $0x58] sm:$0xf0]  ;;  %v1172_v56 = vld [vmem:[#allocation5 + $0x50] sm:$0xf]  ;;  %v1561_v0 = vor.u32 %v1329_v41, %v1104_v40  ;;  %v1154_v1 = vld [vmem:[#allocation5 + $0x3c] sm:$0xf0]  ;;  %v1563_v6 = vor.u32 %v1320_v50, %v1074_v51 }
  0x29   :  { %v1345_v57 = vld [vmem:[#allocation5 + $0x58] sm:$0xf0]  ;;  %v1268_v60 = vld [vmem:[#allocation5 + $0x110] sm:$0xf]  ;;  %v1364_v2 = vld [vmem:[#allocation5 + $0xf4] sm:$0xf]  ;;  %v1565_v7 = vor.u32 %v1328_v52, %v1106_v53 }
  0x2a   :  { %v1369_v61 = vld [vmem:[#allocation5 + $0x118] sm:$0xf0]  ;;  %v1250_v5 = vld [vmem:[#allocation5 + $0xfc] sm:$0xf0]  ;;  %v1160_v12 = vld [vmem:[#allocation5 + $0x38] sm:$0xf] }
  0x2b   :  { %467 = vmatpush.bf16.msra.mxu0 %v1129_v54  ;;  %1389 = vmatpush.bf16.msra.mxu2 %v1129_v54  ;;  %v1185_v54 = vor.u32 %v1348_v37, %v1184_v36  ;;  %v1256_v16 = vld [vmem:[#allocation5 + $0xf8] sm:$0xf]  ;;  %v1366_v17 = vld [vmem:[#allocation5 + $0x100] sm:$0xf0]  ;;  %v1337_v18 = vld [vmem:[#allocation5 + $0x1c] sm:$0xf] }
  0x2c   :  { %516 = vmatpush.bf16.msra.mxu1 %v1225_v58  ;;  %1397 = vmatpush.bf16.msra.mxu3 %v1225_v58  ;;  %v1169_v58 = vor.u32 %v1343_v46, %v1166_v47  ;;  %v1142_v19 = vld [vmem:[#allocation5 + $0x24] sm:$0xf0]  ;;  %v1361_v20 = vld [vmem:[#allocation5 + $0xdc] sm:$0xf]  ;;  %v1148_v24 = vld [vmem:[#allocation5 + $0x20] sm:$0xf] }
  0x2d   :  { %v1339_v25 = vld [vmem:[#allocation5 + $0x28] sm:$0xf0]  ;;  %v1244_v28 = vld [vmem:[#allocation5 + $0xe0] sm:$0xf]  ;;  %v1334_v30 = vld [vmem:[#allocation5 + $0x4] sm:$0xf] }
  0x2e   :  { %468 = vmatmul.bf16.vlgmr.msra.gmra.mxu0 %v1547_v3  ;;  %488 = vmatmul.bf16.vlgmr.msra.gmra.mxu2 %v1549_v4  ;;  %v1363_v29 = vld [vmem:[#allocation5 + $0xe8] sm:$0xf0]  ;;  %v1130_v31 = vld [vmem:[#allocation5 + $0xc] sm:$0xf0]  ;;  %v1358_v32 = vld [vmem:[#allocation5 + $0xc4] sm:$0xf] }
  0x2f   :  { %558 = vmatpush.bf16.msrb.mxu2 %v1217_v62  ;;  %517 = vmatmul.bf16.vlgmr.msra.gmra.mxu1 %v1551_v8  ;;  %v1340_v62 = vld [vmem:[#allocation5 + $0x34] sm:$0xf]  ;;  %v1226_v33 = vld [vmem:[#allocation5 + $0xcc] sm:$0xf0]  ;;  %v1136_v36 = vld [vmem:[#allocation5 + $0x8] sm:$0xf]  ;;  %v1133_v37 = vor.u32 %v1334_v30, %v1130_v31 }
  0x30   :  { %607 = vmatpush.bf16.msrb.mxu3 %v1313_v63  ;;  %656 = vmatpush.bf16.msrb.mxu0 %v1221_v10  ;;  %v1559_v63 = vor.u32 %v1321_v39, %v1072_v38  ;;  %v1173_v10 = vor.u32 %v1345_v57, %v1172_v56  ;;  %v1157_v13 = vor.u32 %v1340_v62, %v1154_v1  ;;  %v1336_v39 = vld [vmem:[#allocation5 + $0x10] sm:$0xf0]  ;;  %v1232_v40 = vld [vmem:[#allocation5 + $0xc8] sm:$0xf]  ;;  %v1112_v44 = vld [vmem:[#allocation2 + $0x60] sm:$0xf] }
  0x31   :  { %537 = vmatmul.bf16.vlgmr.msra.gmra.mxu3 %v1553_v9  ;;  %705 = vmatpush.bf16.msrb.mxu1 %v1317_v11  ;;  %v1269_v11 = vor.u32 %v1369_v61, %v1268_v60  ;;  %v1229_v38 = vor.u32 %v1358_v32, %v1226_v33  ;;  %v1360_v41 = vld [vmem:[#allocation5 + $0xd0] sm:$0xf0]  ;;  %v1331_v45 = vld [vmem:[#allocation2 + $0x64] sm:$0xf0]  ;;  %v1322_v46 = vld [vmem:[#allocation2 + $0x24] sm:$0xf]  ;;  %v1137_v50 = vor.u32 %v1336_v39, %v1136_v36 }
  0x32   :  { %v1082_v47 = vld [vmem:[#allocation2 + $0x28] sm:$0xf0]  ;;  %v1330_v48 = vld [vmem:[#allocation2 + $0x64] sm:$0xf]  ;;  %v1233_v51 = vor.u32 %v1360_v41, %v1232_v40  ;;  %v1571_v53 = vor.u32 %v1331_v45, %v1112_v44  ;;  %v1088_v56 = vld [vmem:[#allocation2 + $0x30] sm:$0xf] }
  0x33   :  { %559 = vmatpush.bf16.msrb.mxu2 %v1205_v14  ;;  %v1253_v14 = vor.u32 %v1364_v2, %v1250_v5  ;;  %v1114_v49 = vld [vmem:[#allocation2 + $0x68] sm:$0xf0]  ;;  %v1325_v57 = vld [vmem:[#allocation2 + $0x34] sm:$0xf0]  ;;  %v1324_v60 = vld [vmem:[#allocation2 + $0x34] sm:$0xf] }
  0x34   :  { %608 = vmatpush.bf16.msrb.mxu3 %v1301_v15  ;;  %657 = vmatpush.bf16.msrb.mxu0 %v1209_v22  ;;  %v1342_v15 = vld [vmem:[#allocation5 + $0x40] sm:$0xf0]  ;;  %v1257_v22 = vor.u32 %v1366_v17, %v1256_v16  ;;  %v1090_v61 = vld [vmem:[#allocation2 + $0x38] sm:$0xf0]  ;;  %v1332_v62 = vld [vmem:[#allocation2 + $0x74] sm:$0xf]  ;;  %v1089_v2 = vor.u32 %v1325_v57, %v1088_v56 }
  0x35   :  { %706 = vmatpush.bf16.msrb.mxu1 %v1305_v23  ;;  %v1161_v21 = vor.u32 %v1342_v15, %v1160_v12  ;;  %v1238_v23 = vld [vmem:[#allocation5 + $0xe4] sm:$0xf0]  ;;  %v1122_v1 = vld [vmem:[#allocation2 + $0x78] sm:$0xf0]  ;;  %s1523_s0 = smov [#allocation7]   ;;  %s1048_s25 = sshll.u32 %s1711_s2, 4  ;;  %s1049_s25 = int_to_ptr.hbm [resolvable:$true] %s1048_s25 }
  0x36   :  { %s1046_s1 = sshll.u32 %s1523_s0, 4  ;;  %s1524_s26 = smov 256   ;;  %s1047_s1 = int_to_ptr.vmem [resolvable:$true] %s1046_s1 }
  0x37   :  { %560 = vmatpush.bf16.msrb.mxu2 %v1193_v26  ;;  %v1145_v26 = vor.u32 %v1337_v18, %v1142_v19  ;;  %s1525_s27 = smov 16  }
  0x38   :  { %609 = vmatpush.bf16.msrb.mxu3 %v1289_v27  ;;  %658 = vmatpush.bf16.msrb.mxu0 %v1197_v34  ;;  %v1241_v27 = vor.u32 %v1361_v20, %v1238_v23  ;;  %v1149_v34 = vor.u32 %v1339_v25, %v1148_v24 }
  0x39   :  { %707 = vmatpush.bf16.msrb.mxu1 %v1293_v35  ;;  %v1245_v35 = vor.u32 %v1363_v29, %v1244_v28 }
  0x3b   :  { %561 = vmatpush.bf16.msrb.mxu2 %v1181_v42  ;;  %v1080_v42 = vld [vmem:[#allocation2 + $0x20] sm:$0xf] }
  0x3c   :  { %610 = vmatpush.bf16.msrb.mxu3 %v1277_v43  ;;  %659 = vmatpush.bf16.msrb.mxu0 %v1185_v54  ;;  %v1323_v43 = vld [vmem:[#allocation2 + $0x24] sm:$0xf0]  ;;  %v1085_v54 = vor.u32 %v1322_v46, %v1082_v47 }
  0x3d   :  { %708 = vmatpush.bf16.msrb.mxu1 %v1281_v55  ;;  %v1081_v52 = vor.u32 %v1323_v43, %v1080_v42  ;;  %v1573_v55 = vor.u32 %v1330_v48, %v1114_v49 }
  0x3e   :  { %473 = vmatmul.bf16.gmra.mxu0 %v1559_v63  ;;  %493 = vmatmul.bf16.gmra.mxu2 %v1561_v0 }
  0x3f   :  { %562 = vmatpush.bf16.msrb.mxu2 %v1169_v58  ;;  %522 = vmatmul.bf16.gmra.mxu1 %v1563_v6  ;;  %v1120_v58 = vld [vmem:[#allocation2 + $0x70] sm:$0xf] }
  0x40   :  { %611 = vmatpush.bf16.msrb.mxu3 %v1265_v59  ;;  %660 = vmatpush.bf16.msrb.mxu0 %v1173_v10  ;;  %v1333_v59 = vld [vmem:[#allocation2 + $0x74] sm:$0xf0]  ;;  %v1093_v10 = vor.u32 %v1324_v60, %v1090_v61 }
  0x41   :  { %542 = vmatmul.bf16.gmra.mxu3 %v1565_v7  ;;  %709 = vmatpush.bf16.msrb.mxu1 %v1269_v11  ;;  %v1577_v5 = vor.u32 %v1333_v59, %v1120_v58  ;;  %v1579_v11 = vor.u32 %v1332_v62, %v1122_v1 }
  0x43   :  { %563 = vmatpush.bf16.msrb.mxu2 %v1157_v13 }
  0x44   :  { %612 = vmatpush.bf16.msrb.mxu3 %v1253_v14  ;;  %661 = vmatpush.bf16.msrb.mxu0 %v1161_v21 }
  0x45   :  { %710 = vmatpush.bf16.msrb.mxu1 %v1257_v22 }
  0x47   :  { %564 = vmatpush.bf16.msrb.mxu2 %v1145_v26 }
  0x48   :  { %613 = vmatpush.bf16.msrb.mxu3 %v1241_v27  ;;  %662 = vmatpush.bf16.msrb.mxu0 %v1149_v34 }
  0x49   :  { %711 = vmatpush.bf16.msrb.mxu1 %v1245_v35 }
  0x4b   :  { %565 = vmatpush.bf16.msrb.mxu2 %v1133_v37 }
  0x4c   :  { %614 = vmatpush.bf16.msrb.mxu3 %v1229_v38  ;;  %663 = vmatpush.bf16.msrb.mxu0 %v1137_v50 }
  0x4d   :  { %712 = vmatpush.bf16.msrb.mxu1 %v1233_v51 }
  0x4e   :  { %478 = vmatmul.bf16.gmra.mxu0 %v1081_v52  ;;  %498 = vmatmul.bf16.gmra.mxu2 %v1571_v53 }
  0x4f   :  { %527 = vmatmul.bf16.gmra.mxu1 %v1085_v54 }
  0x51   :  { %547 = vmatmul.bf16.gmra.mxu3 %v1573_v55 }
  0x5e   :  { %483 = vmatmul.bf16.gmra.mxu0 %v1089_v2  ;;  %503 = vmatmul.bf16.gmra.mxu2 %v1577_v5 }
  0x5f   :  { %532 = vmatmul.bf16.gmra.mxu1 %v1093_v10 }
  0x61   :  { %552 = vmatmul.bf16.gmra.mxu3 %v1579_v11 }
  0x6e   :  { %566 = vmatmul.bf16.vlgmr.msrb.gmra.mxu2 %v1547_v3  ;;  %664 = vmatmul.bf16.vlgmr.msrb.gmra.mxu0 %v1547_v3 }
  0x6f   :  { %713 = vmatmul.bf16.vlgmr.msrb.gmra.mxu1 %v1551_v8 }
  0x71   :  { %615 = vmatmul.bf16.vlgmr.msrb.gmra.mxu3 %v1551_v8 }
  0x7e   :  { %571 = vmatmul.bf16.gmra.mxu2 %v1559_v63  ;;  %669 = vmatmul.bf16.gmra.mxu0 %v1559_v63 }
  0x7f   :  { %718 = vmatmul.bf16.gmra.mxu1 %v1563_v6 }
  0x81   :  { %620 = vmatmul.bf16.gmra.mxu3 %v1563_v6 }
  0x8e   :  { %576 = vmatmul.bf16.gmra.mxu2 %v1081_v52  ;;  %674 = vmatmul.bf16.gmra.mxu0 %v1081_v52 }
  0x8f   :  { %723 = vmatmul.bf16.gmra.mxu1 %v1085_v54 }
  0x91   :  { %625 = vmatmul.bf16.gmra.mxu3 %v1085_v54 }
  0x9e   :  { %581 = vmatmul.bf16.gmra.mxu2 %v1089_v2  ;;  %679 = vmatmul.bf16.gmra.mxu0 %v1089_v2 }
  0x9f   :  { %728 = vmatmul.bf16.gmra.mxu1 %v1093_v10 }
  0xa1   :  { %630 = vmatmul.bf16.gmra.mxu3 %v1093_v10 }
  0xab   :  { %v469_v3 = vpop.f32.mrf.mxu0 }
  0xac   :  { %v518_v12 = vpop.f32.mrf.mxu1 }
  0xad   :  { %v519_v13 = vadd.f32 %v518_v12, %v469_v3 }
  0xae   :  { %586 = vmatmul.bf16.gmra.mxu2 %v1549_v4  ;;  %684 = vmatmul.bf16.gmra.mxu0 %v1549_v4 }
  0xaf   :  { %v754_v8 = vmax.f32 %v519_v13, 0.0  ;;  %733 = vmatmul.bf16.gmra.mxu1 %v1553_v9 }
  0xb1   :  { %635 = vmatmul.bf16.gmra.mxu3 %v1553_v9  ;;  %770 = vst [vmem:[#allocation7] sm:$0xff] %v754_v8  ;;  %v489_v63 = vpop.f32.mrf.mxu2 }
  0xb3   :  { %v471_v15 = vpop.f32.mrf.mxu0 }
  0xb4   :  { %v538_v6 = vpop.f32.mrf.mxu3  ;;  %v520_v16 = vpop.f32.mrf.mxu1 }
  0xb5   :  { %v539_v14 = vadd.f32 %v538_v6, %v489_v63  ;;  %v521_v18 = vadd.f32 %v520_v16, %v471_v15 }
  0xb7   :  { %v762_v17 = vmax.f32 %v539_v14, 0.0  ;;  %v755_v19 = vmax.f32 %v521_v18, 0.0 }
  0xb9   :  { %778 = vst [vmem:[#allocation7 + $0x80] sm:$0xff] %v762_v17  ;;  %v491_v20 = vpop.f32.mrf.mxu2 }
  0xba   :  { %771 = vst [vmem:[#allocation7 + $0x10] sm:$0xff] %v755_v19 }
  0xbb   :  { %v474_v4 = vpop.f32.mrf.mxu0 }
  0xbc   :  { %v540_v21 = vpop.f32.mrf.mxu3  ;;  %v523_v23 = vpop.f32.mrf.mxu1 }
  0xbd   :  { %v541_v22 = vadd.f32 %v540_v21, %v491_v20  ;;  %v524_v25 = vadd.f32 %v523_v23, %v474_v4 }
  0xbe   :  { %591 = vmatmul.bf16.gmra.mxu2 %v1561_v0  ;;  %689 = vmatmul.bf16.gmra.mxu0 %v1561_v0 }
  0xbf   :  { %v763_v24 = vmax.f32 %v541_v22, 0.0  ;;  %v756_v9 = vmax.f32 %v524_v25, 0.0  ;;  %738 = vmatmul.bf16.gmra.mxu1 %v1565_v7 }
  0xc1   :  { %779 = vst [vmem:[#allocation7 + $0x90] sm:$0xff] %v763_v24  ;;  %640 = vmatmul.bf16.gmra.mxu3 %v1565_v7  ;;  %v494_v26 = vpop.f32.mrf.mxu2 }
  0xc2   :  { %772 = vst [vmem:[#allocation7 + $0x20] sm:$0xff] %v756_v9 }
  0xc3   :  { %v476_v29 = vpop.f32.mrf.mxu0 }
  0xc4   :  { %v543_v27 = vpop.f32.mrf.mxu3  ;;  %v525_v30 = vpop.f32.mrf.mxu1 }
  0xc5   :  { %v544_v28 = vadd.f32 %v543_v27, %v494_v26  ;;  %v526_v32 = vadd.f32 %v525_v30, %v476_v29 }
  0xc7   :  { %v764_v31 = vmax.f32 %v544_v28, 0.0  ;;  %v757_v33 = vmax.f32 %v526_v32, 0.0 }
  0xc9   :  { %780 = vst [vmem:[#allocation7 + $0xa0] sm:$0xff] %v764_v31  ;;  %v496_v34 = vpop.f32.mrf.mxu2 }
  0xca   :  { %773 = vst [vmem:[#allocation7 + $0x30] sm:$0xff] %v757_v33 }
  0xcb   :  { %v479_v36 = vpop.f32.mrf.mxu0 }
  0xcc   :  { %v545_v35 = vpop.f32.mrf.mxu3  ;;  %v528_v37 = vpop.f32.mrf.mxu1 }
  0xcd   :  { %v546_v0 = vadd.f32 %v545_v35, %v496_v34  ;;  %v529_v39 = vadd.f32 %v528_v37, %v479_v36 }
  0xce   :  { %596 = vmatmul.bf16.gmra.mxu2 %v1571_v53  ;;  %694 = vmatmul.bf16.gmra.mxu0 %v1571_v53 }
  0xcf   :  { %v765_v38 = vmax.f32 %v546_v0, 0.0  ;;  %v758_v7 = vmax.f32 %v529_v39, 0.0  ;;  %743 = vmatmul.bf16.gmra.mxu1 %v1573_v55 }
  0xd1   :  { %781 = vst [vmem:[#allocation7 + $0xb0] sm:$0xff] %v765_v38  ;;  %645 = vmatmul.bf16.gmra.mxu3 %v1573_v55  ;;  %v499_v40 = vpop.f32.mrf.mxu2 }
  0xd2   :  { %774 = vst [vmem:[#allocation7 + $0x40] sm:$0xff] %v758_v7 }
  0xd3   :  { %v481_v43 = vpop.f32.mrf.mxu0 }
  0xd4   :  { %v548_v41 = vpop.f32.mrf.mxu3  ;;  %v530_v44 = vpop.f32.mrf.mxu1 }
  0xd5   :  { %v549_v42 = vadd.f32 %v548_v41, %v499_v40  ;;  %v531_v46 = vadd.f32 %v530_v44, %v481_v43 }
  0xd7   :  { %v766_v45 = vmax.f32 %v549_v42, 0.0  ;;  %v759_v47 = vmax.f32 %v531_v46, 0.0 }
  0xd9   :  { %782 = vst [vmem:[#allocation7 + $0xc0] sm:$0xff] %v766_v45  ;;  %v501_v48 = vpop.f32.mrf.mxu2 }
  0xda   :  { %775 = vst [vmem:[#allocation7 + $0x50] sm:$0xff] %v759_v47 }
  0xdb   :  { %v484_v51 = vpop.f32.mrf.mxu0 }
  0xdc   :  { %v550_v49 = vpop.f32.mrf.mxu3  ;;  %v533_v52 = vpop.f32.mrf.mxu1 }
  0xdd   :  { %v551_v50 = vadd.f32 %v550_v49, %v501_v48  ;;  %v534_v54 = vadd.f32 %v533_v52, %v484_v51 }
  0xde   :  { %601 = vmatmul.bf16.gmra.mxu2 %v1577_v5  ;;  %699 = vmatmul.bf16.gmra.mxu0 %v1577_v5 }
  0xdf   :  { %v767_v53 = vmax.f32 %v551_v50, 0.0  ;;  %v760_v55 = vmax.f32 %v534_v54, 0.0  ;;  %748 = vmatmul.bf16.gmra.mxu1 %v1579_v11 }
  0xe1   :  { %783 = vst [vmem:[#allocation7 + $0xd0] sm:$0xff] %v767_v53  ;;  %650 = vmatmul.bf16.gmra.mxu3 %v1579_v11  ;;  %v504_v56 = vpop.f32.mrf.mxu2 }
  0xe2   :  { %776 = vst [vmem:[#allocation7 + $0x60] sm:$0xff] %v760_v55 }
  0xe3   :  { %v486_v59 = vpop.f32.mrf.mxu0 }
  0xe4   :  { %v553_v57 = vpop.f32.mrf.mxu3  ;;  %v535_v60 = vpop.f32.mrf.mxu1 }
  0xe5   :  { %v554_v58 = vadd.f32 %v553_v57, %v504_v56  ;;  %v536_v62 = vadd.f32 %v535_v60, %v486_v59 }
  0xe7   :  { %v768_v61 = vmax.f32 %v554_v58, 0.0  ;;  %v761_v1 = vmax.f32 %v536_v62, 0.0 }
  0xe9   :  { %784 = vst [vmem:[#allocation7 + $0xe0] sm:$0xff] %v768_v61  ;;  %v506_v2 = vpop.f32.mrf.mxu2 }
  0xea   :  { %777 = vst [vmem:[#allocation7 + $0x70] sm:$0xff] %v761_v1 }
  0xeb   :  { %v665_v3 = vpop.f32.mrf.mxu0 }
  0xec   :  { %v555_v10 = vpop.f32.mrf.mxu3  ;;  %v714_v12 = vpop.f32.mrf.mxu1 }
  0xed   :  { %v556_v5 = vadd.f32 %v555_v10, %v506_v2  ;;  %v715_v8 = vadd.f32 %v714_v12, %v665_v3 }
  0xef   :  { %v769_v13 = vmax.f32 %v556_v5, 0.0  ;;  %v802_v6 = vmul.f32 %v715_v8, %v715_v8 }
  0xf1   :  { %785 = vst [vmem:[#allocation7 + $0xf0] sm:$0xff] %v769_v13  ;;  %v567_v11 = vpop.f32.mrf.mxu2 }
  0xf3   :  { %v667_v15 = vpop.f32.mrf.mxu0 }
  0xf4   :  { %v616_v63 = vpop.f32.mrf.mxu3  ;;  %v716_v16 = vpop.f32.mrf.mxu1 }
  0xf5   :  { %v617_v14 = vadd.f32 %v616_v63, %v567_v11  ;;  %v717_v19 = vadd.f32 %v716_v16, %v667_v15 }
  0xf7   :  { %v786_v17 = vmul.f32 %v617_v14, %v617_v14  ;;  %v803_v24 = vmul.f32 %v717_v19, %v717_v19 }
  0xf9   :  { %v818_v18 = vadd.f32 %v802_v6, %v786_v17  ;;  %v569_v20 = vpop.f32.mrf.mxu2 }
  0xfb   :  { %1407 = vrsqrt.f32 %v818_v18  ;;  %v670_v4 = vpop.f32.mrf.mxu0  ;;  %vm841_vm0 = vcmp.eq.f32.partialorder %v818_v18, inf  ;;  %v844_v46 = vand.u32 2147483648, %v818_v18  ;;  %vm843_vm1 = vcmp.eq.f32.partialorder %v818_v18, 0.0 }
  0xfc   :  { %v618_v21 = vpop.f32.mrf.mxu3  ;;  %v719_v23 = vpop.f32.mrf.mxu1 }
  0xfd   :  { %v619_v22 = vadd.f32 %v618_v21, %v569_v20  ;;  %v720_v27 = vadd.f32 %v719_v23, %v670_v4 }
  0xff   :  { %v787_v25 = vmul.f32 %v619_v22, %v619_v22  ;;  %v804_v32 = vmul.f32 %v720_v27, %v720_v27 }
 0x101   :  { %v1408_v9 = vpop.eup %1407  ;;  %v819_v26 = vadd.f32 %v803_v24, %v787_v25  ;;  %v572_v29 = vpop.f32.mrf.mxu2 }
 0x102   :  { %v835_v28 = vmul.f32 %v1408_v9, %v818_v18 }
 0x103   :  { %1409 = vrsqrt.f32 %v819_v26  ;;  %v672_v34 = vpop.f32.mrf.mxu0  ;;  %vm853_vm2 = vcmp.eq.f32.partialorder %v819_v26, inf  ;;  %v856_v10 = vand.u32 2147483648, %v819_v26  ;;  %vm855_vm3 = vcmp.eq.f32.partialorder %v819_v26, 0.0 }
 0x104   :  { %v836_v30 = vmul.f32 %v1408_v9, %v835_v28  ;;  %v621_v31 = vpop.f32.mrf.mxu3  ;;  %v721_v0 = vpop.f32.mrf.mxu1 }
 0x105   :  { %v622_v33 = vadd.f32 %v621_v31, %v572_v29  ;;  %v722_v41 = vadd.f32 %v721_v0, %v672_v34 }
 0x106   :  { %v837_v35 = vmul.f32 0.5, %v836_v30 }
 0x107   :  { %v788_v36 = vmul.f32 %v622_v33, %v622_v33  ;;  %v805_v53 = vmul.f32 %v722_v41, %v722_v41 }
 0x108   :  { %v838_v37 = vsub.f32 1.5, %v837_v35 }
 0x109   :  { %v1410_v38 = vpop.eup %1409  ;;  %v1607_v39 = vadd.f32 %v804_v32, %v788_v36  ;;  %v574_v42 = vpop.f32.mrf.mxu2 }
 0x10a   :  { %v839_v7 = vmul.f32 %v1408_v9, %v838_v37  ;;  %v847_v40 = vmul.f32 %v1410_v38, %v819_v26 }
 0x10b   :  { %1411 = vrsqrt.f32 %v1607_v39  ;;  %v675_v48 = vpop.f32.mrf.mxu0  ;;  %vm865_vm4 = vcmp.eq.f32.partialorder %v1607_v39, inf  ;;  %v868_v23 = vand.u32 2147483648, %v1607_v39  ;;  %vm867_vm5 = vcmp.eq.f32.partialorder %v1607_v39, 0.0 }
 0x10c   :  { %v840_v43 = vmul.f32 %v839_v7, %v818_v18  ;;  %v848_v44 = vmul.f32 %v1410_v38, %v847_v40  ;;  %v623_v45 = vpop.f32.mrf.mxu3  ;;  %v724_v51 = vpop.f32.mrf.mxu1 }
 0x10d   :  { %v624_v47 = vadd.f32 %v623_v45, %v574_v42  ;;  %v725_v58 = vadd.f32 %v724_v51, %v675_v48 }
 0x10e   :  { %v842_v49 = vsel %vm841_vm0, %v818_v18, %v840_v43  ;;  %v849_v50 = vmul.f32 0.5, %v848_v44 }
 0x10f   :  { %v845_v52 = vsel %vm843_vm1, %v844_v46, %v842_v49  ;;  %v789_v54 = vmul.f32 %v624_v47, %v624_v47  ;;  %v806_v5 = vmul.f32 %v725_v58, %v725_v58 }
 0x110   :  { %1026 = vst [vmem:[#allocation7 + $0x8] sm:$0xff] %v845_v52  ;;  %v850_v55 = vsub.f32 1.5, %v849_v50 }
 0x111   :  { %v1412_v56 = vpop.eup %1411  ;;  %v1610_v57 = vadd.f32 %v805_v53, %v789_v54  ;;  %v577_v61 = vpop.f32.mrf.mxu2 }
 0x112   :  { %v851_v59 = vmul.f32 %v1410_v38, %v850_v55  ;;  %v859_v60 = vmul.f32 %v1412_v56, %v1607_v39 }
 0x113   :  { %1413 = vrsqrt.f32 %v1610_v57  ;;  %v677_v12 = vpop.f32.mrf.mxu0  ;;  %vm877_vm6 = vcmp.eq.f32.partialorder %v1610_v57, inf  ;;  %v880_v7 = vand.u32 2147483648, %v1610_v57  ;;  %vm879_vm7 = vcmp.eq.f32.partialorder %v1610_v57, 0.0 }
 0x114   :  { %v852_v62 = vmul.f32 %v851_v59, %v819_v26  ;;  %v860_v1 = vmul.f32 %v1412_v56, %v859_v60  ;;  %v626_v2 = vpop.f32.mrf.mxu3  ;;  %v726_v11 = vpop.f32.mrf.mxu1 }
 0x115   :  { %v627_v3 = vadd.f32 %v626_v2, %v577_v61  ;;  %v727_v19 = vadd.f32 %v726_v11, %v677_v12 }
 0x116   :  { %v854_v13 = vsel %vm853_vm2, %v819_v26, %v852_v62  ;;  %v861_v8 = vmul.f32 0.5, %v860_v1 }
 0x117   :  { %v857_v63 = vsel %vm855_vm3, %v856_v10, %v854_v13  ;;  %v790_v6 = vmul.f32 %v627_v3, %v627_v3  ;;  %v807_v29 = vmul.f32 %v727_v19, %v727_v19 }
 0x118   :  { %1027 = vst [vmem:[#allocation7 + $0x18] sm:$0xff] %v857_v63  ;;  %v862_v14 = vsub.f32 1.5, %v861_v8 }
 0x119   :  { %v1414_v15 = vpop.eup %1413  ;;  %v1614_v16 = vadd.f32 %v806_v5, %v790_v6  ;;  %v579_v20 = vpop.f32.mrf.mxu2 }
 0x11a   :  { %v863_v17 = vmul.f32 %v1412_v56, %v862_v14  ;;  %v871_v18 = vmul.f32 %v1414_v15, %v1610_v57 }
 0x11b   :  { %1415 = vrsqrt.f32 %v1614_v16  ;;  %v680_v25 = vpop.f32.mrf.mxu0  ;;  %vm889_vm8 = vcmp.eq.f32.partialorder %v1614_v16, inf  ;;  %v892_v58 = vand.u32 2147483648, %v1614_v16  ;;  %vm891_vm9 = vcmp.eq.f32.partialorder %v1614_v16, 0.0 }
 0x11c   :  { %v864_v21 = vmul.f32 %v863_v17, %v1607_v39  ;;  %v872_v22 = vmul.f32 %v1414_v15, %v871_v18  ;;  %v628_v4 = vpop.f32.mrf.mxu3  ;;  %v729_v27 = vpop.f32.mrf.mxu1 }
 0x11d   :  { %v629_v24 = vadd.f32 %v628_v4, %v579_v20  ;;  %v730_v34 = vadd.f32 %v729_v27, %v680_v25 }
 0x11e   :  { %v866_v9 = vsel %vm865_vm4, %v1607_v39, %v864_v21  ;;  %v873_v26 = vmul.f32 0.5, %v872_v22 }
 0x11f   :  { %v869_v28 = vsel %vm867_vm5, %v868_v23, %v866_v9  ;;  %v791_v30 = vmul.f32 %v629_v24, %v629_v24  ;;  %v808_v40 = vmul.f32 %v730_v34, %v730_v34 }
 0x120   :  { %1028 = vst [vmem:[#allocation7 + $0x28] sm:$0xff] %v869_v28  ;;  %v874_v31 = vsub.f32 1.5, %v873_v26 }
 0x121   :  { %v1416_v32 = vpop.eup %1415  ;;  %v1623_v33 = vadd.f32 %v807_v29, %v791_v30  ;;  %v582_v36 = vpop.f32.mrf.mxu2 }
 0x122   :  { %v875_v35 = vmul.f32 %v1414_v15, %v874_v31  ;;  %v883_v0 = vmul.f32 %v1416_v32, %v1614_v16 }
 0x123   :  { %1417 = vrsqrt.f32 %v1623_v33  ;;  %v682_v42 = vpop.f32.mrf.mxu0  ;;  %vm901_vm10 = vcmp.eq.f32.partialorder %v1623_v33, inf  ;;  %v904_v17 = vand.u32 2147483648, %v1623_v33  ;;  %vm903_vm11 = vcmp.eq.f32.partialorder %v1623_v33, 0.0 }
 0x124   :  { %v876_v37 = vmul.f32 %v875_v35, %v1610_v57  ;;  %v884_v38 = vmul.f32 %v1416_v32, %v883_v0  ;;  %v631_v39 = vpop.f32.mrf.mxu3  ;;  %v731_v45 = vpop.f32.mrf.mxu1 }
 0x125   :  { %v632_v41 = vadd.f32 %v631_v39, %v582_v36  ;;  %v732_v53 = vadd.f32 %v731_v45, %v682_v42 }
 0x126   :  { %v878_v43 = vsel %vm877_vm6, %v1610_v57, %v876_v37  ;;  %v885_v44 = vmul.f32 0.5, %v884_v38 }
 0x127   :  { %v881_v46 = vsel %vm879_vm7, %v880_v7, %v878_v43  ;;  %v792_v47 = vmul.f32 %v632_v41, %v632_v41  ;;  %v809_v10 = vmul.f32 %v732_v53, %v732_v53 }
 0x128   :  { %1029 = vst [vmem:[#allocation7 + $0x38] sm:$0xff] %v881_v46  ;;  %v886_v48 = vsub.f32 1.5, %v885_v44 }
 0x129   :  { %v1418_v49 = vpop.eup %1417  ;;  %v1632_v50 = vadd.f32 %v808_v40, %v792_v47  ;;  %v584_v54 = vpop.f32.mrf.mxu2 }
 0x12a   :  { %v887_v51 = vmul.f32 %v1416_v32, %v886_v48  ;;  %v895_v52 = vmul.f32 %v1418_v49, %v1623_v33 }
 0x12b   :  { %1419 = vrsqrt.f32 %v1632_v50  ;;  %v685_v60 = vpop.f32.mrf.mxu0  ;;  %vm913_vm12 = vcmp.eq.f32.partialorder %v1632_v50, inf  ;;  %v916_v34 = vand.u32 2147483648, %v1632_v50  ;;  %vm915_vm13 = vcmp.eq.f32.partialorder %v1632_v50, 0.0 }
 0x12c   :  { %v888_v55 = vmul.f32 %v887_v51, %v1614_v16  ;;  %v896_v56 = vmul.f32 %v1418_v49, %v895_v52  ;;  %v633_v57 = vpop.f32.mrf.mxu3  ;;  %v734_v1 = vpop.f32.mrf.mxu1 }
 0x12d   :  { %v634_v59 = vadd.f32 %v633_v57, %v584_v54  ;;  %v735_v8 = vadd.f32 %v734_v1, %v685_v60 }
 0x12e   :  { %v890_v61 = vsel %vm889_vm8, %v1614_v16, %v888_v55  ;;  %v897_v62 = vmul.f32 0.5, %v896_v56 }
 0x12f   :  { %v893_v2 = vsel %vm891_vm9, %v892_v58, %v890_v61  ;;  %v793_v5 = vmul.f32 %v634_v59, %v634_v59  ;;  %v810_v18 = vmul.f32 %v735_v8, %v735_v8 }
 0x130   :  { %1030 = vst [vmem:[#allocation7 + $0x48] sm:$0xff] %v893_v2  ;;  %v898_v3 = vsub.f32 1.5, %v897_v62 }
 0x131   :  { %v1420_v12 = vpop.eup %1419  ;;  %v1641_v13 = vadd.f32 %v809_v10, %v793_v5  ;;  %v587_v6 = vpop.f32.mrf.mxu2 }
 0x132   :  { %v899_v11 = vmul.f32 %v1418_v49, %v898_v3  ;;  %v907_v63 = vmul.f32 %v1420_v12, %v1632_v50 }
 0x133   :  { %1421 = vrsqrt.f32 %v1641_v13  ;;  %v687_v20 = vpop.f32.mrf.mxu0  ;;  %vm925_vm14 = vcmp.eq.f32.partialorder %v1641_v13, inf  ;;  %v928_v51 = vand.u32 2147483648, %v1641_v13  ;;  %vm927_vm15 = vcmp.eq.f32.partialorder %v1641_v13, 0.0 }
 0x134   :  { %v900_v14 = vmul.f32 %v899_v11, %v1623_v33  ;;  %v908_v15 = vmul.f32 %v1420_v12, %v907_v63  ;;  %v636_v16 = vpop.f32.mrf.mxu3  ;;  %v736_v4 = vpop.f32.mrf.mxu1 }
 0x135   :  { %v637_v19 = vadd.f32 %v636_v16, %v587_v6  ;;  %v737_v29 = vadd.f32 %v736_v4, %v687_v20 }
 0x136   :  { %v902_v21 = vsel %vm901_vm10, %v1623_v33, %v900_v14  ;;  %v909_v22 = vmul.f32 0.5, %v908_v15 }
 0x137   :  { %v905_v23 = vsel %vm903_vm11, %v904_v17, %v902_v21  ;;  %v794_v24 = vmul.f32 %v637_v19, %v637_v19  ;;  %v811_v7 = vmul.f32 %v737_v29, %v737_v29 }
 0x138   :  { %1031 = vst [vmem:[#allocation7 + $0x58] sm:$0xff] %v905_v23  ;;  %v910_v25 = vsub.f32 1.5, %v909_v22 }
 0x139   :  { %v1422_v9 = vpop.eup %1421  ;;  %v1650_v26 = vadd.f32 %v810_v18, %v794_v24  ;;  %v589_v30 = vpop.f32.mrf.mxu2 }
 0x13a   :  { %v911_v27 = vmul.f32 %v1420_v12, %v910_v25  ;;  %v919_v28 = vmul.f32 %v1422_v9, %v1641_v13 }
 0x13b   :  { %1423 = vrsqrt.f32 %v1650_v26  ;;  %v690_v0 = vpop.f32.mrf.mxu0  ;;  %vm937_vm0 = vcmp.eq.f32.partialorder %v1650_v26, inf  ;;  %v940_v8 = vand.u32 2147483648, %v1650_v26  ;;  %vm939_vm1 = vcmp.eq.f32.partialorder %v1650_v26, 0.0 }
 0x13c   :  { %v912_v31 = vmul.f32 %v911_v27, %v1632_v50  ;;  %v920_v32 = vmul.f32 %v1422_v9, %v919_v28  ;;  %v638_v33 = vpop.f32.mrf.mxu3  ;;  %v739_v38 = vpop.f32.mrf.mxu1 }
 0x13d   :  { %v639_v35 = vadd.f32 %v638_v33, %v589_v30  ;;  %v740_v44 = vadd.f32 %v739_v38, %v690_v0 }
 0x13e   :  { %v914_v36 = vsel %vm913_vm12, %v1632_v50, %v912_v31  ;;  %v921_v37 = vmul.f32 0.5, %v920_v32 }
 0x13f   :  { %v917_v39 = vsel %vm915_vm13, %v916_v34, %v914_v36  ;;  %v795_v40 = vmul.f32 %v639_v35, %v639_v35  ;;  %v812_v52 = vmul.f32 %v740_v44, %v740_v44 }
 0x140   :  { %1032 = vst [vmem:[#allocation7 + $0x68] sm:$0xff] %v917_v39  ;;  %v922_v41 = vsub.f32 1.5, %v921_v37 }
 0x141   :  { %v1424_v42 = vpop.eup %1423  ;;  %v1659_v43 = vadd.f32 %v811_v7, %v795_v40  ;;  %v592_v47 = vpop.f32.mrf.mxu2 }
 0x142   :  { %v923_v45 = vmul.f32 %v1422_v9, %v922_v41  ;;  %v931_v46 = vmul.f32 %v1424_v42, %v1650_v26 }
 0x143   :  { %1425 = vrsqrt.f32 %v1659_v43  ;;  %v692_v54 = vpop.f32.mrf.mxu0  ;;  %vm949_vm2 = vcmp.eq.f32.partialorder %v1659_v43, inf  ;;  %v952_v27 = vand.u32 2147483648, %v1659_v43  ;;  %vm951_vm3 = vcmp.eq.f32.partialorder %v1659_v43, 0.0 }
 0x144   :  { %v924_v48 = vmul.f32 %v923_v45, %v1641_v13  ;;  %v932_v49 = vmul.f32 %v1424_v42, %v931_v46  ;;  %v641_v50 = vpop.f32.mrf.mxu3  ;;  %v741_v57 = vpop.f32.mrf.mxu1 }
 0x145   :  { %v642_v53 = vadd.f32 %v641_v50, %v592_v47  ;;  %v742_v10 = vadd.f32 %v741_v57, %v692_v54 }
 0x146   :  { %v926_v55 = vsel %vm925_vm14, %v1641_v13, %v924_v48  ;;  %v933_v56 = vmul.f32 0.5, %v932_v49 }
 0x147   :  { %v929_v58 = vsel %vm927_vm15, %v928_v51, %v926_v55  ;;  %v796_v59 = vmul.f32 %v642_v53, %v642_v53  ;;  %v813_v17 = vmul.f32 %v742_v10, %v742_v10 }
 0x148   :  { %1033 = vst [vmem:[#allocation7 + $0x78] sm:$0xff] %v929_v58  ;;  %v934_v60 = vsub.f32 1.5, %v933_v56 }
 0x149   :  { %v1426_v61 = vpop.eup %1425  ;;  %v1668_v62 = vadd.f32 %v812_v52, %v796_v59  ;;  %v594_v5 = vpop.f32.mrf.mxu2 }
 0x14a   :  { %v935_v1 = vmul.f32 %v1424_v42, %v934_v60  ;;  %v943_v2 = vmul.f32 %v1426_v61, %v1659_v43 }
 0x14b   :  { %1427 = vrsqrt.f32 %v1668_v62  ;;  %v695_v63 = vpop.f32.mrf.mxu0  ;;  %vm961_vm4 = vcmp.eq.f32.partialorder %v1668_v62, inf  ;;  %v964_v44 = vand.u32 2147483648, %v1668_v62  ;;  %vm963_vm5 = vcmp.eq.f32.partialorder %v1668_v62, 0.0 }
 0x14c   :  { %v936_v3 = vmul.f32 %v935_v1, %v1650_v26  ;;  %v944_v12 = vmul.f32 %v1426_v61, %v943_v2  ;;  %v643_v13 = vpop.f32.mrf.mxu3  ;;  %v744_v15 = vpop.f32.mrf.mxu1 }
 0x14d   :  { %v644_v11 = vadd.f32 %v643_v13, %v594_v5  ;;  %v745_v22 = vadd.f32 %v744_v15, %v695_v63 }
 0x14e   :  { %v938_v6 = vsel %vm937_vm0, %v1650_v26, %v936_v3  ;;  %v945_v14 = vmul.f32 0.5, %v944_v12 }
 0x14f   :  { %v941_v16 = vsel %vm939_vm1, %v940_v8, %v938_v6  ;;  %v797_v18 = vmul.f32 %v644_v11, %v644_v11  ;;  %v814_v28 = vmul.f32 %v745_v22, %v745_v22 }
 0x150   :  { %1034 = vst [vmem:[#allocation7 + $0x88] sm:$0xff] %v941_v16  ;;  %v946_v19 = vsub.f32 1.5, %v945_v14 }
 0x151   :  { %v1428_v20 = vpop.eup %1427  ;;  %v1677_v21 = vadd.f32 %v813_v17, %v797_v18  ;;  %v597_v24 = vpop.f32.mrf.mxu2 }
 0x152   :  { %v947_v4 = vmul.f32 %v1426_v61, %v946_v19  ;;  %v955_v23 = vmul.f32 %v1428_v20, %v1668_v62 }
 0x153   :  { %1429 = vrsqrt.f32 %v1677_v21  ;;  %v697_v30 = vpop.f32.mrf.mxu0  ;;  %vm973_vm6 = vcmp.eq.f32.partialorder %v1677_v21, inf  ;;  %v976_v1 = vand.u32 2147483648, %v1677_v21  ;;  %vm975_vm7 = vcmp.eq.f32.partialorder %v1677_v21, 0.0 }
 0x154   :  { %v948_v25 = vmul.f32 %v947_v4, %v1659_v43  ;;  %v956_v9 = vmul.f32 %v1428_v20, %v955_v23  ;;  %v646_v26 = vpop.f32.mrf.mxu3  ;;  %v746_v33 = vpop.f32.mrf.mxu1 }
 0x155   :  { %v647_v29 = vadd.f32 %v646_v26, %v597_v24  ;;  %v747_v7 = vadd.f32 %v746_v33, %v697_v30 }
 0x156   :  { %v950_v31 = vsel %vm949_vm2, %v1659_v43, %v948_v25  ;;  %v957_v32 = vmul.f32 0.5, %v956_v9 }
 0x157   :  { %v953_v34 = vsel %vm951_vm3, %v952_v27, %v950_v31  ;;  %v798_v35 = vmul.f32 %v647_v29, %v647_v29  ;;  %v815_v51 = vmul.f32 %v747_v7, %v747_v7 }
 0x158   :  { %1035 = vst [vmem:[#allocation7 + $0x98] sm:$0xff] %v953_v34  ;;  %v958_v0 = vsub.f32 1.5, %v957_v32 }
 0x159   :  { %v1430_v36 = vpop.eup %1429  ;;  %v1686_v37 = vadd.f32 %v814_v28, %v798_v35  ;;  %v599_v40 = vpop.f32.mrf.mxu2 }
 0x15a   :  { %v959_v38 = vmul.f32 %v1428_v20, %v958_v0  ;;  %v967_v39 = vmul.f32 %v1430_v36, %v1677_v21 }
 0x15b   :  { %1431 = vrsqrt.f32 %v1686_v37  ;;  %v700_v48 = vpop.f32.mrf.mxu0  ;;  %vm985_vm8 = vcmp.eq.f32.partialorder %v1686_v37, inf  ;;  %vm987_vm9 = vcmp.eq.f32.partialorder %v1686_v37, 0.0 }
 0x15c   :  { %v960_v41 = vmul.f32 %v959_v38, %v1668_v62  ;;  %v968_v42 = vmul.f32 %v1430_v36, %v967_v39  ;;  %v648_v43 = vpop.f32.mrf.mxu3  ;;  %v749_v49 = vpop.f32.mrf.mxu1 }
 0x15d   :  { %v649_v45 = vadd.f32 %v648_v43, %v599_v40  ;;  %v750_v56 = vadd.f32 %v749_v49, %v700_v48 }
 0x15e   :  { %v962_v46 = vsel %vm961_vm4, %v1668_v62, %v960_v41  ;;  %v969_v47 = vmul.f32 0.5, %v968_v42 }
 0x15f   :  { %v965_v50 = vsel %vm963_vm5, %v964_v44, %v962_v46  ;;  %v799_v52 = vmul.f32 %v649_v45, %v649_v45  ;;  %v816_v2 = vmul.f32 %v750_v56, %v750_v56 }
 0x160   :  { %1036 = vst [vmem:[#allocation7 + $0xa8] sm:$0xff] %v965_v50  ;;  %v970_v53 = vsub.f32 1.5, %v969_v47 }
 0x161   :  { %v1432_v54 = vpop.eup %1431  ;;  %v831_v55 = vadd.f32 %v815_v51, %v799_v52  ;;  %v602_v59 = vpop.f32.mrf.mxu2 }
 0x162   :  { %v971_v57 = vmul.f32 %v1430_v36, %v970_v53  ;;  %v979_v58 = vmul.f32 %v1432_v54, %v1686_v37 }
 0x163   :  { %1433 = vrsqrt.f32 %v831_v55  ;;  %v702_v11 = vpop.f32.mrf.mxu0  ;;  %vm997_vm10 = vcmp.eq.f32.partialorder %v831_v55, inf  ;;  %v1000_v34 = vand.u32 2147483648, %v831_v55  ;;  %vm999_vm11 = vcmp.eq.f32.partialorder %v831_v55, 0.0 }
 0x164   :  { %v972_v60 = vmul.f32 %v971_v57, %v1677_v21  ;;  %v980_v61 = vmul.f32 %v1432_v54, %v979_v58  ;;  %v651_v62 = vpop.f32.mrf.mxu3  ;;  %v751_v63 = vpop.f32.mrf.mxu1 }
 0x165   :  { %v652_v10 = vadd.f32 %v651_v62, %v602_v59  ;;  %v752_v17 = vadd.f32 %v751_v63, %v702_v11 }
 0x166   :  { %v974_v5 = vsel %vm973_vm6, %v1677_v21, %v972_v60  ;;  %v981_v3 = vmul.f32 0.5, %v980_v61  ;;  %v988_v21 = vand.u32 2147483648, %v1686_v37 }
 0x167   :  { %v977_v12 = vsel %vm975_vm7, %v976_v1, %v974_v5  ;;  %v800_v13 = vmul.f32 %v652_v10, %v652_v10  ;;  %v817_v9 = vmul.f32 %v752_v17, %v752_v17 }
 0x168   :  { %1037 = vst [vmem:[#allocation7 + $0xb8] sm:$0xff] %v977_v12  ;;  %v982_v8 = vsub.f32 1.5, %v981_v3 }
 0x169   :  { %v1434_v6 = vpop.eup %1433  ;;  %v832_v14 = vadd.f32 %v816_v2, %v800_v13  ;;  %v604_v18 = vpop.f32.mrf.mxu2 }
 0x16a   :  { %v983_v15 = vmul.f32 %v1432_v54, %v982_v8  ;;  %v991_v16 = vmul.f32 %v1434_v6, %v831_v55 }
 0x16b   :  { %1435 = vrsqrt.f32 %v832_v14  ;;  %vm1009_vm12 = vcmp.eq.f32.partialorder %v832_v14, inf  ;;  %v1012_v42 = vand.u32 2147483648, %v832_v14  ;;  %vm1011_vm13 = vcmp.eq.f32.partialorder %v832_v14, 0.0 }
 0x16c   :  { %v984_v19 = vmul.f32 %v983_v15, %v1686_v37  ;;  %v992_v20 = vmul.f32 %v1434_v6, %v991_v16  ;;  %v653_v22 = vpop.f32.mrf.mxu3 }
 0x16d   :  { %v654_v4 = vadd.f32 %v653_v22, %v604_v18 }
 0x16e   :  { %v986_v23 = vsel %vm985_vm8, %v1686_v37, %v984_v19  ;;  %v993_v24 = vmul.f32 0.5, %v992_v20 }
 0x16f   :  { %v989_v25 = vsel %vm987_vm9, %v988_v21, %v986_v23  ;;  %v801_v26 = vmul.f32 %v654_v4, %v654_v4 }
 0x170   :  { %1038 = vst [vmem:[#allocation7 + $0xc8] sm:$0xff] %v989_v25  ;;  %v994_v27 = vsub.f32 1.5, %v993_v24 }
 0x171   :  { %v1436_v28 = vpop.eup %1435  ;;  %v833_v29 = vadd.f32 %v817_v9, %v801_v26 }
 0x172   :  { %v995_v30 = vmul.f32 %v1434_v6, %v994_v27  ;;  %v1003_v31 = vmul.f32 %v1436_v28, %v832_v14 }
 0x173   :  { %1437 = vrsqrt.f32 %v833_v29  ;;  %vm1021_vm14 = vcmp.eq.f32.partialorder %v833_v29, inf  ;;  %v1024_v49 = vand.u32 2147483648, %v833_v29  ;;  %vm1023_vm15 = vcmp.eq.f32.partialorder %v833_v29, 0.0 }
 0x174   :  { %v996_v32 = vmul.f32 %v995_v30, %v831_v55  ;;  %v1004_v33 = vmul.f32 %v1436_v28, %v1003_v31 }
 0x176   :  { %v998_v35 = vsel %vm997_vm10, %v831_v55, %v996_v32  ;;  %v1005_v0 = vmul.f32 0.5, %v1004_v33 }
 0x177   :  { %v1001_v36 = vsel %vm999_vm11, %v1000_v34, %v998_v35 }
 0x178   :  { %1039 = vst [vmem:[#allocation7 + $0xd8] sm:$0xff] %v1001_v36  ;;  %v1006_v37 = vsub.f32 1.5, %v1005_v0 }
 0x179   :  { %v1438_v38 = vpop.eup %1437 }
 0x17a   :  { %v1007_v39 = vmul.f32 %v1436_v28, %v1006_v37  ;;  %v1015_v7 = vmul.f32 %v1438_v38, %v833_v29 }
 0x17c   :  { %v1008_v40 = vmul.f32 %v1007_v39, %v832_v14  ;;  %v1016_v41 = vmul.f32 %v1438_v38, %v1015_v7 }
 0x17e   :  { %v1010_v43 = vsel %vm1009_vm12, %v832_v14, %v1008_v40  ;;  %v1017_v44 = vmul.f32 0.5, %v1016_v41 }
 0x17f   :  { %v1013_v45 = vsel %vm1011_vm13, %v1012_v42, %v1010_v43 }
 0x180   :  { %1040 = vst [vmem:[#allocation7 + $0xe8] sm:$0xff] %v1013_v45  ;;  %v1018_v46 = vsub.f32 1.5, %v1017_v44 }
 0x182   :  { %v1019_v47 = vmul.f32 %v1438_v38, %v1018_v46 }
 0x184   :  { %v1020_v48 = vmul.f32 %v1019_v47, %v833_v29 }
 0x186   :  { %v1022_v50 = vsel %vm1021_vm14, %v833_v29, %v1020_v48 }
 0x187   :  { %v1025_v51 = vsel %vm1023_vm15, %v1024_v49, %v1022_v50 }
 0x188   :  { %1041 = vst [vmem:[#allocation7 + $0xf8] sm:$0xff] %v1025_v51 }
 0x189   :  { %1054 = dma.vmem_to_hbm [thread:$0]  %s1047_s1, 4096, %s1049_s25, [#allocation4], %s1524_s26, %s1524_s26, %s1525_s27  }
 0x18a   :  { %1515 = dma.done.wait [#allocation4], 4096  }
 0x18b   :  { %1516 = vsyncadd [#allocation4], 4294963200 }
 0x18c   :  { %1059 = vsyncpa [#allocation3], 1 }
 0x18d   :  { %1060 = vsyncpa [#allocation6], 1 }
 0x18e   :  { %1061 = vsyncpa [#allocation4], 1 }

</bundles_post_ra>
